<compile_context>
chip_gen: v6e
topology: v6e:2x2x1
jax: 0.10.0
libtpu: 0.0.40
codegen_flags: <defaults>
</compile_context>

<pallas_src>
from functools import partial

import jax
import jax.numpy as jnp
from jax.experimental import pallas as pl
from jax.experimental.pallas import tpu as pltpu


LANE = 128
SUBLANE = 8


def _round_up(x, m):
    return (x + m - 1) // m * m


# ----------------------------------------------------------------------------
# Pallas kernel: one lane-dense fused matmul per grid step (bias pre-folded).
# ----------------------------------------------------------------------------
def decoder_kernel(w_ref, x_ref, o_ref):
    # w_ref : (Cout_pad, K_pad)  folded weights (last valid column = bias)
    # x_ref : (K_pad, TN)        lane-dense input slab tile (TN multiple of 128)
    # o_ref : (Cout_pad, TN)     lane-dense output tile
    o_ref[...] = jnp.dot(
        w_ref[...], x_ref[...], preferred_element_type=jnp.float32
    ).astype(o_ref.dtype)


# ----------------------------------------------------------------------------
# Wrapper: NCHW in / NCHW out (PyTorch convention).
# ----------------------------------------------------------------------------
@jax.jit
def decoder_forward(fore_x, curr_x, params):
    """fore_x: (B, C1, H, W), curr_x: (B, C2, H, W)  ->  (B, Cout, H, W)."""
    w1, b1, w2t, b2, w3, b3 = params  # PyTorch-shaped parameters

    B, C1, H, W = fore_x.shape
    C2 = curr_x.shape[1]
    C1h = w1.shape[0]
    C2h = w2t.shape[1]
    Cout = w3.shape[0]
    Ktot = C1 + 9 * C2

    # --- fold all three (purely linear) convs into one weight matrix ---------
    w1_mat = w1[:, :, 0, 0]                                   # (C1h, C1)
    w3a = w3[:, :C1h, 0, 0]                                   # (Cout, C1h)
    w3b = w3[:, C1h:, 0, 0]                                   # (Cout, C2h)
    # ConvTranspose2d(k=3, p=1, s=1) == 3x3 "same" conv with flipped kernel:
    #   w2_k[kh, kw, i, o] = w2t[i, o, 2-kh, 2-kw]
    w2_k = jnp.flip(jnp.transpose(w2t, (2, 3, 0, 1)), axis=(0, 1))  # (3,3,C2,C2h)

    w_fore = w3a @ w1_mat                                     # (Cout, C1)
    w_curr = jnp.einsum('oc,hwic->hwoi', w3b, w2_k)           # (3,3,Cout,C2)
    b_all = w3a @ b1 + w3b @ b2 + b3                          # (Cout,)

    # Bias folded in as an extra contraction row (ones row in X).
    w_all = jnp.concatenate(
        [w_fore]
        + [w_curr[kh, kw] for kh in range(3) for kw in range(3)]
        + [b_all[:, None]],
        axis=1,
    ).astype(jnp.float32)                                     # (Cout, Ktot+1)

    # --- pad to sublane-aligned sizes (unmasked loads/stores) ----------------
    K = Ktot + 1
    K_pad = _round_up(K, SUBLANE)
    Cout_pad = _round_up(Cout, SUBLANE)
    w_all = jnp.pad(w_all, ((0, Cout_pad - Cout), (0, K_pad - K)))

    # --- lane-dense input slab: K on sublanes, B*H*W on lanes ----------------
    curr_pad = jnp.pad(curr_x, ((0, 0), (0, 0), (1, 1), (1, 1)))
    taps = [curr_pad[:, :, kh:kh + H, kw:kw + W]              # 9 x (B, C2, H, W)
            for kh in range(3) for kw in range(3)]
    x_all = jnp.concatenate([fore_x] + taps, axis=1)          # (B, Ktot, H, W)
    N = B * H * W
    x_all = jnp.transpose(x_all, (1, 0, 2, 3)).reshape(Ktot, N).astype(jnp.float32)
    x_all = jnp.concatenate(
        [x_all,
         jnp.ones((1, N), jnp.float32),                       # bias row
         jnp.zeros((K_pad - K, N), jnp.float32)],             # sublane padding
        axis=0)                                               # (K_pad, N)

    # --- lane-axis tiling: whole problem in one step when small --------------
    bytes_per_col = 4 * (K_pad + Cout_pad)         # one input + one output col
    max_tn = max(LANE, (4 * 1024 * 1024 // bytes_per_col) // LANE * LANE)
    TN = min(_round_up(N, LANE), max_tn)
    N_pad = _round_up(N, TN)
    if N_pad != N:
        x_all = jnp.pad(x_all, ((0, 0), (0, N_pad - N)))

    out_flat = pl.pallas_call(
        decoder_kernel,
        out_shape=jax.ShapeDtypeStruct((Cout_pad, N_pad), jnp.float32),
        grid_spec=pltpu.PrefetchScalarGridSpec(
            num_scalar_prefetch=0,
            grid=(N_pad // TN,),
            in_specs=[
                pl.BlockSpec((Cout_pad, K_pad), lambda n: (0, 0)),
                pl.BlockSpec((K_pad, TN), lambda n: (0, n)),
            ],
            out_specs=pl.BlockSpec((Cout_pad, TN), lambda n: (0, n)),
        ),
        compiler_params=pltpu.CompilerParams(
            dimension_semantics=("parallel",),
            vmem_limit_bytes=32 * 1024 * 1024,
        ),
    )(w_all, x_all)

    # (Cout_pad, N_pad) -> (B, Cout, H, W)
    out = out_flat[:Cout, :N].reshape(Cout, B, H, W)
    return jnp.transpose(out, (1, 0, 2, 3))


# ----------------------------------------------------------------------------
# Pure-JAX reference that mirrors PyTorch math directly (for verification).
# ----------------------------------------------------------------------------
def decoder_reference(fore_x, curr_x, params):
    w1, b1, w2t, b2, w3, b3 = params
    B, C2, H, W = curr_x.shape
    # conv1 (1x1)
    x1 = (jnp.einsum('bchw,oc->bohw', fore_x, w1[:, :, 0, 0])
          + b1[None, :, None, None])
    # ConvTranspose2d (k=3, p=1, s=1):
    #   y[b,o,h,w] = sum_{i,kh,kw} x[b,i,h+1-kh,w+1-kw] * Wt[i,o,kh,kw] + b[o]
    xpad = jnp.pad(curr_x, ((0, 0), (0, 0), (1, 1), (1, 1)))
    x2 = jnp.zeros((B, w2t.shape[1], H, W), jnp.float32)
    for kh in range(3):
        for kw in range(3):
            patch = xpad[:, :, 2 - kh:2 - kh + H, 2 - kw:2 - kw + W]
            x2 = x2 + jnp.einsum('bihw,io->bohw', patch, w2t[:, :, kh, kw])
    x2 = x2 + b2[None, :, None, None]
    xcat = jnp.concatenate([x1, x2], axis=1)
    o = (jnp.einsum('bchw,oc->bohw', xcat, w3[:, :, 0, 0])
         + b3[None, :, None, None])
    return o


if __name__ == "__main__":
    # Small shapes: batch=2, channel1=channel2=4, spatial 16x16.
    B, C1, C2, H, W = 2, 4, 4, 16, 16
    C1h, C2h = C1 // 2, C2 // 2
    Cin3 = C1h + C2h
    Cout = Cin3 // 2

    key = jax.random.PRNGKey(0)
    ks = jax.random.split(key, 8)
    # Deterministic synthetic parameters (PyTorch-shaped).
    w1 = jax.random.normal(ks[0], (C1h, C1, 1, 1), jnp.float32) * 0.2
    b1 = jax.random.normal(ks[1], (C1h,), jnp.float32) * 0.1
    w2t = jax.random.normal(ks[2], (C2, C2h, 3, 3), jnp.float32) * 0.2
    b2 = jax.random.normal(ks[3], (C2h,), jnp.float32) * 0.1
    w3 = jax.random.normal(ks[4], (Cout, Cin3, 1, 1), jnp.float32) * 0.2
    b3 = jax.random.normal(ks[5], (Cout,), jnp.float32) * 0.1
    params = (w1, b1, w2t, b2, w3, b3)

    fore_x = jax.random.normal(ks[6], (B, C1, H, W), jnp.float32)
    curr_x = jax.random.normal(ks[7], (B, C2, H, W), jnp.float32)

    out = decoder_forward(fore_x, curr_x, params)
    out = jax.block_until_ready(out)

    ref = decoder_reference(fore_x, curr_x, params)
    assert out.shape == (B, Cout, H, W), out.shape
    assert jnp.allclose(out, ref, atol=1e-4, rtol=1e-4), \
        float(jnp.max(jnp.abs(out - ref)))

    print("KERNEL_OK")
</pallas_src>

<mosaic_0001>
module attributes {stable_mosaic.version = 11 : i64} {
  func.func @decoder_kernel(%arg0: i32, %arg1: memref<8x48xf32, #tpu.memory_space<vmem>>, %arg2: memref<48x512xf32, #tpu.memory_space<vmem>>, %arg3: memref<8x512xf32, #tpu.memory_space<vmem>>) attributes {dimension_semantics = [#tpu.dimension_semantics<parallel>], iteration_bounds = array<i64: 1>, scalar_prefetch = 0 : i64, scratch_operands = 0 : i64, tpu.core_type = #tpu.core_type<tc>, window_params = [{pipeline_mode = #tpu.pipeline_mode<synchronous>, transform_indices = @transform_0, window_bounds = array<i64: 8, 48>}, {transform_indices = @transform_1, window_bounds = array<i64: 48, 512>}, {transform_indices = @transform_2, window_bounds = array<i64: 8, 512>}]} {
    %c0 = arith.constant 0 : index
    %c0_0 = arith.constant 0 : index
    %0 = vector.load %arg1[%c0, %c0_0] : memref<8x48xf32, #tpu.memory_space<vmem>>, vector<8x48xf32>
    %c0_1 = arith.constant 0 : index
    %c0_2 = arith.constant 0 : index
    %1 = vector.load %arg2[%c0_1, %c0_2] : memref<48x512xf32, #tpu.memory_space<vmem>>, vector<48x512xf32>
    %cst = arith.constant dense<0.000000e+00> : vector<8x512xf32>
    %2 = tpu.matmul %0, %1, %cst {dimension_numbers = #tpu.dot_dimension_numbers<[1], [0], [0], [1], [0, 0, 1, 1], [], []>} : vector<8x48xf32>, vector<48x512xf32>, vector<8x512xf32> -> vector<8x512xf32>
    %c0_3 = arith.constant 0 : index
    %c0_4 = arith.constant 0 : index
    %3 = vector.load %arg3[%c0_3, %c0_4] : memref<8x512xf32, #tpu.memory_space<vmem>>, vector<8x512xf32>
    tpu.vector_store %arg3[%c0_3, %c0_4], %2 {strides = array<i32>} : memref<8x512xf32, #tpu.memory_space<vmem>>, vector<8x512xf32>,
    return
  }
  func.func @transform_0(%arg0: i32) -> (i32, i32) {
    %c0_i32 = arith.constant 0 : i32
    %c0_i32_0 = arith.constant 0 : i32
    %c0_i32_1 = arith.constant 0 : i32
    return %c0_i32, %c0_i32_0 : i32, i32
  }
  func.func @transform_1(%arg0: i32) -> (i32, i32) {
    %c0_i32 = arith.constant 0 : i32
    %c0_i32_0 = arith.constant 0 : i32
    return %c0_i32, %arg0 : i32, i32
  }
  func.func @transform_2(%arg0: i32) -> (i32, i32) {
    %c0_i32 = arith.constant 0 : i32
    %c0_i32_0 = arith.constant 0 : i32
    return %c0_i32, %arg0 : i32, i32
  }
}

</mosaic_0001>

<bundles_post_ra>
// kernel: decoder_forward.1
= control target key start
LH: loop header
LB: loop body
LE: loop exit
PB: predicated region body
PF: predicated region fallthrough
CT: control target
= control target key end

     0   :  { %v193_v3 = vmov 0.0   ;;  %vm36_vm0 = vcmask 392192   ;;  %s296_s1 = inlined_call_operand.vmem [shape: f32[48,512], index: 1, kind: input, shape index: {}]   ;;  %s297_s0 = inlined_call_operand.vmem [shape: f32[8,48], index: 0, kind: input, shape index: {}]   ;;  %s298_s2 = inlined_call_operand.vmem [shape: f32[8,512], index: 2, kind: output, shape index: {}]  }
   0x1   :  { %v33_v0 = vld [vmem:[%s296_s1 + $0xa8] sm:$0xff]  ;;  %v35_v1 = vld [vmem:[%s296_s1 + $0xb8] sm:$0xff]  ;;  %v32_v2 = vld [vmem:[%s296_s1 + $0xa0] sm:$0xff]  ;;  %104 = vmatprep.mubr.f32.mxu0 %v193_v3  ;;  %175 = vmatprep.mubr.f32.mxu1 %v193_v3 }
   0x2   :  { %60 = vmatprep.subr.mxu0 %v33_v0  ;;  %131 = vmatprep.subr.mxu1 %v35_v1  ;;  %v34_v4 = vld [vmem:[%s296_s1 + $0xb0] sm:$0xff]  ;;  %v29_v5 = vld [vmem:[%s296_s1 + $0x88] sm:$0xff]  ;;  %v31_v6 = vld [vmem:[%s296_s1 + $0x98] sm:$0xff] }
   0x3   :  { %61 = vmatpush1.msra.mxu0 %v32_v2  ;;  %132 = vmatpush1.msra.mxu1 %v34_v4  ;;  %v28_v7 = vld [vmem:[%s296_s1 + $0x80] sm:$0xff]  ;;  %v30_v8 = vld [vmem:[%s296_s1 + $0x90] sm:$0xff]  ;;  %v25_v9 = vld [vmem:[%s296_s1 + $0x68] sm:$0xff] }
   0x4   :  { %62 = vmatprep.subr.mxu0 %v29_v5  ;;  %133 = vmatprep.subr.mxu1 %v31_v6  ;;  %v27_v10 = vld [vmem:[%s296_s1 + $0x78] sm:$0xff]  ;;  %v24_v11 = vld [vmem:[%s296_s1 + $0x60] sm:$0xff]  ;;  %v26_v12 = vld [vmem:[%s296_s1 + $0x70] sm:$0xff] }
   0x5   :  { %63 = vmatpush1.msra.mxu0 %v28_v7  ;;  %134 = vmatpush1.msra.mxu1 %v30_v8  ;;  %v21_v13 = vld [vmem:[%s296_s1 + $0x48] sm:$0xff]  ;;  %v23_v14 = vld [vmem:[%s296_s1 + $0x58] sm:$0xff]  ;;  %v20_v15 = vld [vmem:[%s296_s1 + $0x40] sm:$0xff] }
   0x6   :  { %64 = vmatprep.subr.mxu0 %v25_v9  ;;  %135 = vmatprep.subr.mxu1 %v27_v10  ;;  %v22_v16 = vld [vmem:[%s296_s1 + $0x50] sm:$0xff]  ;;  %v17_v17 = vld [vmem:[%s296_s1 + $0x28] sm:$0xff]  ;;  %v19_v18 = vld [vmem:[%s296_s1 + $0x38] sm:$0xff] }
   0x7   :  { %65 = vmatpush1.msra.mxu0 %v24_v11  ;;  %136 = vmatpush1.msra.mxu1 %v26_v12  ;;  %v16_v19 = vld [vmem:[%s296_s1 + $0x20] sm:$0xff]  ;;  %v18_v20 = vld [vmem:[%s296_s1 + $0x30] sm:$0xff]  ;;  %v13_v21 = vld [vmem:[%s296_s1 + $0x8] sm:$0xff] }
   0x8   :  { %66 = vmatprep.subr.mxu0 %v21_v13  ;;  %137 = vmatprep.subr.mxu1 %v23_v14  ;;  %v15_v22 = vld [vmem:[%s296_s1 + $0x18] sm:$0xff]  ;;  %v12_v23 = vld [vmem:[%s296_s1] sm:$0xff]  ;;  %v14_v24 = vld [vmem:[%s296_s1 + $0x10] sm:$0xff] }
   0x9   :  { %67 = vmatpush1.msra.mxu0 %v20_v15  ;;  %138 = vmatpush1.msra.mxu1 %v22_v16  ;;  %v11_v25 = vld [vmem:[%s297_s0] sm:$0xff] }
   0xa   :  { %68 = vmatprep.subr.mxu0 %v17_v17  ;;  %139 = vmatprep.subr.mxu1 %v19_v18 }
   0xb   :  { %69 = vmatpush1.msra.mxu0 %v16_v19  ;;  %140 = vmatpush1.msra.mxu1 %v18_v20 }
   0xc   :  { %70 = vmatprep.subr.mxu0 %v13_v21  ;;  %141 = vmatprep.subr.mxu1 %v15_v22 }
   0xd   :  { %71 = vmatpush1.msra.mxu0 %v12_v23  ;;  %142 = vmatpush1.msra.mxu1 %v14_v24 }
   0xe   :  { %190 = vmatmul.mubr.msk.f32.vlgmr.msra.gmra.mxu0 %vm36_vm0, %v11_v25  ;;  %191 = vmatmul.mubr.msk.f32.vlgmr.msra.gmra.mxu1 %vm36_vm0, %v11_v25 }
  0xce   :  { %v106_v26 = vpop.f32.mrf.mxu0  ;;  %v177_v27 = vpop.f32.mrf.mxu1 }
  0xcf   :  { %182 = vst [vmem:[%s298_s2] sm:$0xff] %v106_v26  ;;  %184 = vst [vmem:[%s298_s2 + $0x10] sm:$0xff] %v177_v27 }
  0xd0   :  { %v108_v28 = vpop.f32.mrf.mxu0  ;;  %v179_v29 = vpop.f32.mrf.mxu1 }
  0xd1   :  { %183 = vst [vmem:[%s298_s2 + $0x8] sm:$0xff] %v108_v28  ;;  %185 = vst [vmem:[%s298_s2 + $0x18] sm:$0xff] %v179_v29 }

</bundles_post_ra>
